<compile_context>
chip_gen: v6e
topology: v6e:2x2x1
jax: 0.10.0
libtpu: 0.0.40
codegen_flags: <defaults>
</compile_context>

<pallas_src>
import jax
import jax.numpy as jnp
from jax.experimental import pallas as pl
from jax.experimental.pallas import tpu as pltpu


def _round_up(x, m):
    return (x + m - 1) // m * m


def avg_pool_fc_kernel(batch_ref, x_ref, w_ref, b_ref, out_ref, sum_acc, cnt_acc):
    # batch_ref: (1, TILE_N) int32     graph id per node (-1 => padding node)
    # x_ref:     (TILE_N, F) f32       node features for this tile
    # w_ref:     (O_PAD, F)  f32       linear weight, PyTorch [out, in] layout (rows >= O are 0)
    # b_ref:     (1, O_PAD)  f32       linear bias (lanes >= O are 0)
    # out_ref:   (B_PAD, O_PAD) f32    per-graph logits (resident across the N grid axis)
    # sum_acc:   (B_PAD, F)  f32       running per-graph feature sums
    # cnt_acc:   (B_PAD, 1)  f32       running per-graph node counts
    n = pl.program_id(0)
    b_pad = out_ref.shape[0]
    tile_n = batch_ref.shape[1]

    @pl.when(n == 0)
    def _init():
        sum_acc[...] = jnp.zeros_like(sum_acc)
        cnt_acc[...] = jnp.zeros_like(cnt_acc)

    batch_ids = batch_ref[...]                                            # (1, TILE_N)
    graph_ids = jax.lax.broadcasted_iota(jnp.int32, (b_pad, tile_n), 0)   # (B_PAD, TILE_N)
    assign = (graph_ids == batch_ids).astype(jnp.float32)                 # one-hot rows

    cnt_acc[...] += jnp.sum(assign, axis=-1, keepdims=True)               # (B_PAD, 1)
    sum_acc[...] += jnp.dot(assign, x_ref[...],
                            preferred_element_type=jnp.float32)           # (B_PAD, F) on MXU

    @pl.when(n == pl.num_programs(0) - 1)
    def _finalize():
        # Count normalization folded into a single scale; reciprocal runs on the EUP slot.
        inv = pl.reciprocal(jnp.maximum(cnt_acc[...], 1.0), approx=True)  # (B_PAD, 1)
        pooled = sum_acc[...] * inv                                       # (B_PAD, F)
        # pooled @ W^T with W kept in [O, F] layout (no wrapper transpose).
        out_ref[...] = jax.lax.dot_general(
            pooled, w_ref[...],
            dimension_numbers=(((1,), (1,)), ((), ())),
            preferred_element_type=jnp.float32) + b_ref[...]


def avg_pool_fc(x, batch, weight, bias, num_graphs, *, max_tile_n=1024):
    """global_mean_pool(x, batch) followed by the Linear layer.

    x: [N, F] float, batch: [N] int graph ids in [0, num_graphs),
    weight: [O, F] (PyTorch nn.Linear layout), bias: [O].
    Returns [num_graphs, O] float32.
    """
    N, F = x.shape
    O = weight.shape[0]

    b_pad = _round_up(max(num_graphs, 8), 8)       # sublane-dense output rows
    o_pad = _round_up(max(O, 128), 128)            # lane-dense output columns
    tile_n = min(max_tile_n, _round_up(N, 8))      # node tile; bounded VMEM on v7x
    n_pad = _round_up(N, tile_n)

    x_p = jnp.zeros((n_pad, F), jnp.float32).at[:N, :].set(x.astype(jnp.float32))
    # Padding nodes get id -1 so they never match any graph row.
    batch_p = jnp.full((1, n_pad), -1, jnp.int32).at[0, :N].set(batch.astype(jnp.int32))
    w_p = jnp.zeros((o_pad, F), jnp.float32).at[:O, :].set(weight.astype(jnp.float32))
    b_p = jnp.zeros((1, o_pad), jnp.float32).at[0, :O].set(bias.astype(jnp.float32))

    grid = (n_pad // tile_n,)

    out_padded = pl.pallas_call(
        avg_pool_fc_kernel,
        out_shape=jax.ShapeDtypeStruct((b_pad, o_pad), jnp.float32),
        grid_spec=pltpu.PrefetchScalarGridSpec(
            num_scalar_prefetch=0,
            grid=grid,
            in_specs=[
                pl.BlockSpec((1, tile_n), lambda n: (0, n)),    # batch ids (tiled over N)
                pl.BlockSpec((tile_n, F), lambda n: (n, 0)),    # node features (tiled over N)
                pl.BlockSpec((o_pad, F), lambda n: (0, 0)),     # weight (VMEM-resident)
                pl.BlockSpec((1, o_pad), lambda n: (0, 0)),     # bias (VMEM-resident)
            ],
            out_specs=pl.BlockSpec((b_pad, o_pad), lambda n: (0, 0)),  # resident accumT output
            scratch_shapes=[
                pltpu.VMEM((b_pad, F), jnp.float32),            # per-graph feature sums
                pltpu.VMEM((b_pad, 1), jnp.float32),            # per-graph node counts
            ],
        ),
        compiler_params=pltpu.CompilerParams(
            dimension_semantics=("arbitrary",),                 # N is a reduction axis
        ),
    )(batch_p, x_p, w_p, b_p)

    return out_padded[:num_graphs, :O]


if __name__ == "__main__":
    # Small shapes consistent with the module's forward:
    #   N nodes with F-dim features, B graphs, 10 output classes.
    N, F, B, O = 16, 512, 2, 10

    key = jax.random.PRNGKey(0)
    kx, kw, kb = jax.random.split(key, 3)

    x = jax.random.normal(kx, (N, F), dtype=jnp.float32)
    # deterministic sorted graph assignment: first 9 nodes -> graph 0, rest -> graph 1
    batch = jnp.concatenate([jnp.zeros((9,), jnp.int32), jnp.ones((N - 9,), jnp.int32)])

    # nn.Linear(in_features=F, out_features=10) init: U(-1/sqrt(F), 1/sqrt(F))
    bound = 1.0 / jnp.sqrt(jnp.float32(F))
    weight = jax.random.uniform(kw, (O, F), jnp.float32, -bound, bound)
    bias = jax.random.uniform(kb, (O,), jnp.float32, -bound, bound)

    out = avg_pool_fc(x, batch, weight, bias, B)
    out = jax.block_until_ready(out)

    # Reference (plain JAX) check of global_mean_pool + Linear.
    seg_sum = jax.ops.segment_sum(x, batch, num_segments=B)
    counts = jax.ops.segment_sum(jnp.ones((N,), jnp.float32), batch, num_segments=B)
    pooled_ref = seg_sum / jnp.maximum(counts, 1.0)[:, None]
    out_ref = pooled_ref @ weight.T + bias
    # Slightly looser tolerance: pl.reciprocal(approx=True) is the EUP approximate vrcp.
    assert jnp.allclose(out, out_ref, atol=1e-2, rtol=1e-2), "mismatch vs reference"

    print("KERNEL_OK")
</pallas_src>

<mosaic_0001>
module attributes {stable_mosaic.version = 11 : i64} {
  func.func @avg_pool_fc_kernel(%arg0: i32, %arg1: memref<1x16xi32, #tpu.memory_space<vmem>>, %arg2: memref<16x512xf32, #tpu.memory_space<vmem>>, %arg3: memref<128x512xf32, #tpu.memory_space<vmem>>, %arg4: memref<1x128xf32, #tpu.memory_space<vmem>>, %arg5: memref<8x128xf32, #tpu.memory_space<vmem>>, %arg6: memref<8x512xf32, #tpu.memory_space<vmem>>, %arg7: memref<8x1xf32, #tpu.memory_space<vmem>>) attributes {dimension_semantics = [#tpu.dimension_semantics<arbitrary>], iteration_bounds = array<i64: 1>, scalar_prefetch = 0 : i64, scratch_operands = 2 : i64, tpu.core_type = #tpu.core_type<tc>, window_params = [{transform_indices = @transform_0, window_bounds = array<i64: 1, 16>}, {transform_indices = @transform_1, window_bounds = array<i64: 16, 512>}, {pipeline_mode = #tpu.pipeline_mode<synchronous>, transform_indices = @transform_2, window_bounds = array<i64: 128, 512>}, {pipeline_mode = #tpu.pipeline_mode<synchronous>, transform_indices = @transform_3, window_bounds = array<i64: 1, 128>}, {pipeline_mode = #tpu.pipeline_mode<synchronous>, transform_indices = @transform_4, window_bounds = array<i64: 8, 128>}]} {
    %c0_i32 = arith.constant 0 : i32
    %0 = arith.cmpi eq, %arg0, %c0_i32 : i32
    %1 = arith.extui %0 : i1 to i32
    %c0_i32_0 = arith.constant 0 : i32
    %2 = arith.cmpi ne, %1, %c0_i32_0 : i32
    scf.if %2 {
      %cst_15 = arith.constant 0.000000e+00 : f32
      %22 = vector.broadcast %cst_15 : f32 to vector<8x512xf32>
      %c0_16 = arith.constant 0 : index
      %c0_17 = arith.constant 0 : index
      %23 = vector.load %arg6[%c0_16, %c0_17] : memref<8x512xf32, #tpu.memory_space<vmem>>, vector<8x512xf32>
      tpu.vector_store %arg6[%c0_16, %c0_17], %22 {strides = array<i32>} : memref<8x512xf32, #tpu.memory_space<vmem>>, vector<8x512xf32>,
      %cst_18 = arith.constant 0.000000e+00 : f32
      %24 = vector.broadcast %cst_18 : f32 to vector<8x1xf32>
      %c0_19 = arith.constant 0 : index
      %c0_20 = arith.constant 0 : index
      %25 = vector.load %arg7[%c0_19, %c0_20] : memref<8x1xf32, #tpu.memory_space<vmem>>, vector<8x1xf32>
      tpu.vector_store %arg7[%c0_19, %c0_20], %24 {strides = array<i32>} : memref<8x1xf32, #tpu.memory_space<vmem>>, vector<8x1xf32>,
    } else {
    }
    %c0 = arith.constant 0 : index
    %c0_1 = arith.constant 0 : index
    %3 = vector.load %arg1[%c0, %c0_1] : memref<1x16xi32, #tpu.memory_space<vmem>>, vector<1x16xi32>
    %4 = tpu.iota {dimensions = array<i32: 0>} : vector<8x16xi32>
    %5 = vector.broadcast %3 : vector<1x16xi32> to vector<8x16xi32>
    %6 = arith.cmpi eq, %4, %5 : vector<8x16xi32>
    %7 = arith.extui %6 : vector<8x16xi1> to vector<8x16xi32>
    %8 = arith.sitofp %7 : vector<8x16xi32> to vector<8x16xf32>
    %c0_2 = arith.constant 0 : index
    %c0_3 = arith.constant 0 : index
    %9 = vector.load %arg7[%c0_2, %c0_3] : memref<8x1xf32, #tpu.memory_space<vmem>>, vector<8x1xf32>
    %cst = arith.constant dense<0.000000e+00> : vector<8xf32>
    %10 = vector.multi_reduction <add>, %8, %cst [1] : vector<8x16xf32> to vector<8xf32>
    %11 = vector.shape_cast %10 : vector<8xf32> to vector<8x1xf32>
    %12 = arith.addf %9, %11 : vector<8x1xf32>
    %c0_4 = arith.constant 0 : index
    %c0_5 = arith.constant 0 : index
    %13 = vector.load %arg7[%c0_4, %c0_5] : memref<8x1xf32, #tpu.memory_space<vmem>>, vector<8x1xf32>
    tpu.vector_store %arg7[%c0_4, %c0_5], %12 {strides = array<i32>} : memref<8x1xf32, #tpu.memory_space<vmem>>, vector<8x1xf32>,
    %c0_6 = arith.constant 0 : index
    %c0_7 = arith.constant 0 : index
    %14 = vector.load %arg6[%c0_6, %c0_7] : memref<8x512xf32, #tpu.memory_space<vmem>>, vector<8x512xf32>
    %c0_8 = arith.constant 0 : index
    %c0_9 = arith.constant 0 : index
    %15 = vector.load %arg2[%c0_8, %c0_9] : memref<16x512xf32, #tpu.memory_space<vmem>>, vector<16x512xf32>
    %cst_10 = arith.constant dense<0.000000e+00> : vector<8x512xf32>
    %16 = tpu.matmul %8, %15, %cst_10 {dimension_numbers = #tpu.dot_dimension_numbers<[1], [0], [0], [1], [0, 0, 1, 1], [], []>} : vector<8x16xf32>, vector<16x512xf32>, vector<8x512xf32> -> vector<8x512xf32>
    %17 = arith.addf %14, %16 : vector<8x512xf32>
    %c0_11 = arith.constant 0 : index
    %c0_12 = arith.constant 0 : index
    %18 = vector.load %arg6[%c0_11, %c0_12] : memref<8x512xf32, #tpu.memory_space<vmem>>, vector<8x512xf32>
    tpu.vector_store %arg6[%c0_11, %c0_12], %17 {strides = array<i32>} : memref<8x512xf32, #tpu.memory_space<vmem>>, vector<8x512xf32>,
    %c0_i32_13 = arith.constant 0 : i32
    %19 = arith.cmpi eq, %arg0, %c0_i32_13 : i32
    %20 = arith.extui %19 : i1 to i32
    %c0_i32_14 = arith.constant 0 : i32
    %21 = arith.cmpi ne, %20, %c0_i32_14 : i32
    scf.if %21 {
      %c0_15 = arith.constant 0 : index
      %c0_16 = arith.constant 0 : index
      %22 = vector.load %arg7[%c0_15, %c0_16] : memref<8x1xf32, #tpu.memory_space<vmem>>, vector<8x1xf32>
      %cst_17 = arith.constant 1.000000e+00 : f32
      %23 = vector.broadcast %cst_17 : f32 to vector<8x1xf32>
      %24 = arith.maximumf %22, %23 : vector<8x1xf32>
      %25 = tpu.reciprocal %24 {approx = true} : vector<8x1xf32> -> vector<8x1xf32>
      %c0_18 = arith.constant 0 : index
      %c0_19 = arith.constant 0 : index
      %26 = vector.load %arg6[%c0_18, %c0_19] : memref<8x512xf32, #tpu.memory_space<vmem>>, vector<8x512xf32>
      %27 = vector.broadcast %25 : vector<8x1xf32> to vector<8x512xf32>
      %28 = arith.mulf %26, %27 : vector<8x512xf32>
      %c0_20 = arith.constant 0 : index
      %c0_21 = arith.constant 0 : index
      %29 = vector.load %arg3[%c0_20, %c0_21] : memref<128x512xf32, #tpu.memory_space<vmem>>, vector<128x512xf32>
      %cst_22 = arith.constant dense<0.000000e+00> : vector<8x128xf32>
      %30 = tpu.matmul %28, %29, %cst_22 {dimension_numbers = #tpu.dot_dimension_numbers<[1], [1], [0], [0], [0, 0, 1, 0], [], []>} : vector<8x512xf32>, vector<128x512xf32>, vector<8x128xf32> -> vector<8x128xf32>
      %c0_23 = arith.constant 0 : index
      %c0_24 = arith.constant 0 : index
      %31 = vector.load %arg4[%c0_23, %c0_24] : memref<1x128xf32, #tpu.memory_space<vmem>>, vector<1x128xf32>
      %32 = vector.broadcast %31 : vector<1x128xf32> to vector<8x128xf32>
      %33 = arith.addf %30, %32 : vector<8x128xf32>
      %c0_25 = arith.constant 0 : index
      %c0_26 = arith.constant 0 : index
      %34 = vector.load %arg5[%c0_25, %c0_26] : memref<8x128xf32, #tpu.memory_space<vmem>>, vector<8x128xf32>
      tpu.vector_store %arg5[%c0_25, %c0_26], %33 {strides = array<i32>} : memref<8x128xf32, #tpu.memory_space<vmem>>, vector<8x128xf32>,
    } else {
    }
    return
  }
  func.func @transform_0(%arg0: i32) -> (i32, i32) {
    %c0_i32 = arith.constant 0 : i32
    %c0_i32_0 = arith.constant 0 : i32
    return %c0_i32, %arg0 : i32, i32
  }
  func.func @transform_1(%arg0: i32) -> (i32, i32) {
    %c0_i32 = arith.constant 0 : i32
    %c0_i32_0 = arith.constant 0 : i32
    return %arg0, %c0_i32 : i32, i32
  }
  func.func @transform_2(%arg0: i32) -> (i32, i32) {
    %c0_i32 = arith.constant 0 : i32
    %c0_i32_0 = arith.constant 0 : i32
    %c0_i32_1 = arith.constant 0 : i32
    return %c0_i32, %c0_i32_0 : i32, i32
  }
  func.func @transform_3(%arg0: i32) -> (i32, i32) {
    %c0_i32 = arith.constant 0 : i32
    %c0_i32_0 = arith.constant 0 : i32
    %c0_i32_1 = arith.constant 0 : i32
    return %c0_i32, %c0_i32_0 : i32, i32
  }
  func.func @transform_4(%arg0: i32) -> (i32, i32) {
    %c0_i32 = arith.constant 0 : i32
    %c0_i32_0 = arith.constant 0 : i32
    %c0_i32_1 = arith.constant 0 : i32
    return %c0_i32, %c0_i32_0 : i32, i32
  }
}

</mosaic_0001>

<bundles_post_ra>
// kernel: tpu_custom_call.1
= control target key start
LH: loop header
LB: loop body
LE: loop exit
PB: predicated region body
PF: predicated region fallthrough
CT: control target
= control target key end

     0   :  { %9 = vsyncpa [#allocation5], 0  ;;  %s652_s0 = inlined_call_operand.hbm [shape: s32[1,16], index: 0, kind: input, shape index: {}]   ;;  %s653_s1 = inlined_call_operand.hbm [shape: f32[16,512], index: 1, kind: input, shape index: {}]   ;;  %s654_s2 = inlined_call_operand.hbm [shape: f32[128,512], index: 2, kind: input, shape index: {}]   ;;  %s655_s3 = inlined_call_operand.vmem [shape: f32[1,128], index: 3, kind: input, shape index: {}]   ;;  %s656_s4 = inlined_call_operand.hbm [shape: f32[8,128], index: 4, kind: output, shape index: {}]  }
   0x1   :  { %10 = vsyncpa [#allocation8], 0 }
   0x2   :  { %11 = vsyncpa [#allocation6], 0  ;;  %s599_s15 = smov [#allocation7]  }
   0x3   :  { %s27_s16 = sshll.u32 %s599_s15, 4  ;;  %s28_s16 = int_to_ptr.vmem [resolvable:$true] %s27_s16 }
   0x4   :  { %s521_s17 = scalar_lea.vmem %s28_s16, 1024  ;;  %p526_p1 = scmp.lt.s32.totalorder %s28_s16, %s28_s16 }
   0x5   :  { %p522_p0 = scmp.ne.s32.totalorder %s28_s16, %s521_s17  ;;  %p527_p2 = scmp.lt.s32.totalorder %s521_s17, %s521_s17 }
   0x7   :  { %p528_p3 = por %p527_p2, %p526_p1 }
   0x9   :  { %p529_p4 = pnand %p528_p3, %p522_p0 }
   0xb   :  { %532 = shalt.err (!%p529_p4)
}
   0xc   :  { %s600_s18 = smov 512   ;;  %s601_s19 = smov 32  }
   0xd   :  { %33 = dma.hbm_to_vmem [thread:$0]  %s653_s1, 1024, %s28_s16, [#allocation8], %s600_s18, %s600_s18, %s601_s19  }
   0xe   :  { %s602_s22 = smov [#allocation4]   ;;  %s603_s24 = smov [#allocation9]  }
   0xf   :  { %s18_s23 = sshll.u32 %s602_s22, 4  ;;  %s39_s25 = sshll.u32 %s603_s24, 4  ;;  %s19_s23 = int_to_ptr.vmem [resolvable:$true] %s18_s23  ;;  %s40_s25 = int_to_ptr.vmem [resolvable:$true] %s39_s25 }
  0x10   :  { %s541_s26 = scalar_lea.vmem %s19_s23, 16  ;;  %s545_s27 = scalar_lea.vmem %s19_s23, 32 }
  0x11   :  { %p542_p5 = scmp.ne.s32.totalorder %s19_s23, %s541_s26  ;;  %p546_p6 = scmp.lt.s32.totalorder %s19_s23, %s19_s23 }
  0x12   :  { %p547_p7 = scmp.lt.s32.totalorder %s545_s27, %s541_s26 }
  0x14   :  { %p548_p8 = por %p547_p7, %p546_p6 }
  0x16   :  { %p549_p9 = pnand %p548_p8, %p542_p5 }
  0x18   :  { %552 = shalt.err (!%p549_p9)
}
  0x19   :  { %21 = dma.hbm_to_vmem [thread:$0]  %s652_s0, 16, %s19_s23, [#allocation5]  }
  0x1a   :  { %s561_s30 = scalar_lea.vmem %s40_s25, 8192  ;;  %p566_p11 = scmp.lt.s32.totalorder %s40_s25, %s40_s25 }
  0x1b   :  { %p562_p10 = scmp.ne.s32.totalorder %s40_s25, %s561_s30  ;;  %p567_p12 = scmp.lt.s32.totalorder %s561_s30, %s561_s30 }
  0x1d   :  { %p568_p13 = por %p567_p12, %p566_p11 }
  0x1f   :  { %p569_p0 = pnand %p568_p13, %p562_p10 }
  0x21   :  { %572 = shalt.err (!%p569_p0)
}
  0x22   :  { %45 = dma.hbm_to_vmem [thread:$0]  %s654_s2, 8192, %s40_s25, [#allocation8], %s600_s18, %s600_s18, %s601_s19  }
  0x23   :  { %593 = dma.done.wait [#allocation5], 16  }
  0x24   :  { %594 = vsyncadd [#allocation5], 4294967280 }
  0x25   :  { %595 = dma.done.wait [#allocation8], 9216  }
  0x26   :  { %596 = vsyncadd [#allocation8], 4294958080  ;;  %vm65_vm0 = vcmask 7168   ;;  %v68_v0 = vlaneseq  ;;  %v604_v1 = vmov 0.0   ;;  %v497_v3 = vld [vmem:[#allocation4] ss:$0 sm:$0xff] }
  0x27   :  { %66 = vst.msk [vmem:[#allocation3] sm:$0xff] %vm65_vm0, %v604_v1  ;;  %164 = vmatprep.mubr.f32.mxu0 %v604_v1  ;;  %235 = vmatprep.mubr.f32.mxu1 %v604_v1  ;;  %vm78_vm1 = vcmask 130048   ;;  %v94_v4 = vld [vmem:[#allocation7 + $0x28] sm:$0xff]  ;;  %v93_v5 = vld [vmem:[#allocation7 + $0x20] sm:$0xff]  ;;  %v96_v7 = vld [vmem:[#allocation7 + $0x38] sm:$0xff]  ;;  %v605_v14 = vmov 0  }
  0x28   :  { %v69_v2 = vshrl.u32 %v68_v0, 7  ;;  %128 = vmatprep.subr.mxu0 %v94_v4  ;;  %v90_v6 = vld [vmem:[#allocation7 + $0x8] sm:$0xff]  ;;  %v89_v8 = vld [vmem:[#allocation7] sm:$0xff]  ;;  %199 = vmatprep.subr.mxu1 %v96_v7  ;;  %v95_v10 = vld [vmem:[#allocation7 + $0x30] sm:$0xff]  ;;  %s606_s6 = smov [#allocation10]  }
  0x29   :  { %129 = vmatpush1.msra.mxu0 %v93_v5  ;;  %v92_v11 = vld [vmem:[#allocation7 + $0x18] sm:$0xff]  ;;  %200 = vmatpush1.msra.mxu1 %v95_v10  ;;  %v91_v13 = vld [vmem:[#allocation7 + $0x10] sm:$0xff]  ;;  %v330_v15 = vld [vmem:[#allocation9 + $0x1e8] sm:$0xff]  ;;  %s487_s7 = sshll.u32 %s606_s6, 4  ;;  %s488_s7 = int_to_ptr.vmem [resolvable:$true] %s487_s7 }
  0x2a   :  { %vm74_vm2 = vcmp.eq.s32.totalorder %v69_v2, %v497_v3  ;;  %130 = vmatprep.subr.mxu0 %v90_v6  ;;  %201 = vmatprep.subr.mxu1 %v92_v11  ;;  %v332_v16 = vld [vmem:[#allocation9 + $0x1f8] sm:$0xff]  ;;  %v329_v17 = vld [vmem:[#allocation9 + $0x1e0] sm:$0xff]  ;;  %v331_v18 = vld [vmem:[#allocation9 + $0x1f0] sm:$0xff]  ;;  %s573_s8 = scalar_lea.vmem %s488_s7, 128  ;;  %p578_p2 = scmp.lt.s32.totalorder %s488_s7, %s488_s7 }
  0x2b   :  { %v498_v9 = vsel %vm74_vm2, 1.0, %v604_v1  ;;  %131 = vmatpush1.msra.mxu0 %v89_v8  ;;  %202 = vmatpush1.msra.mxu1 %v91_v13  ;;  %v326_v19 = vld [vmem:[#allocation9 + $0x1c8] sm:$0xff]  ;;  %v328_v20 = vld [vmem:[#allocation9 + $0x1d8] sm:$0xff]  ;;  %v325_v21 = vld [vmem:[#allocation9 + $0x1c0] sm:$0xff]  ;;  %p574_p1 = scmp.ne.s32.totalorder %s488_s7, %s573_s8  ;;  %p579_p3 = scmp.lt.s32.totalorder %s573_s8, %s573_s8 }
  0x2c   :  { %v79_v12 = vsel %vm78_vm1, %v498_v9, 0.0  ;;  %499 = vmatmul.mubr.msk.f32.vlgmr.msra.gmra.mxu0 %vm78_vm1, %v498_v9  ;;  %500 = vmatmul.mubr.msk.f32.vlgmr.msra.gmra.mxu1 %vm78_vm1, %v498_v9  ;;  %v327_v22 = vld [vmem:[#allocation9 + $0x1d0] sm:$0xff]  ;;  %v322_v23 = vld [vmem:[#allocation9 + $0x1a8] sm:$0xff]  ;;  %v324_v24 = vld [vmem:[#allocation9 + $0x1b8] sm:$0xff] }
  0x2d   :  { %80 = vadd.xlane.f32.xlu0 %v79_v12  ;;  %340 = vmatprep.subr.mxu0 %v330_v15  ;;  %v321_v25 = vld [vmem:[#allocation9 + $0x1a0] sm:$0xff]  ;;  %v323_v26 = vld [vmem:[#allocation9 + $0x1b0] sm:$0xff]  ;;  %v318_v27 = vld [vmem:[#allocation9 + $0x188] sm:$0xff]  ;;  %p580_p4 = por %p579_p3, %p578_p2 }
  0x2e   :  { %510 = vset.pattern.permute.xlu0 %v605_v14  ;;  %410 = vmatprep.subr.mxu1 %v332_v16  ;;  %v320_v28 = vld [vmem:[#allocation9 + $0x198] sm:$0xff]  ;;  %v317_v29 = vld [vmem:[#allocation9 + $0x180] sm:$0xff]  ;;  %v319_v30 = vld [vmem:[#allocation9 + $0x190] sm:$0xff] }
  0x2f   :  { %341 = vmatpush1.xpose.msra.mxu0 %v329_v17  ;;  %411 = vmatpush1.xpose.msra.mxu1 %v331_v18  ;;  %v314_v31 = vld [vmem:[#allocation9 + $0x168] sm:$0xff]  ;;  %v316_v32 = vld [vmem:[#allocation9 + $0x178] sm:$0xff]  ;;  %v313_v33 = vld [vmem:[#allocation9 + $0x160] sm:$0xff]  ;;  %p581_p5 = pnand %p580_p4, %p574_p1 }
  0x30   :  { %342 = vmatprep.subr.mxu0 %v326_v19  ;;  %412 = vmatprep.subr.mxu1 %v328_v20  ;;  %v315_v34 = vld [vmem:[#allocation9 + $0x170] sm:$0xff]  ;;  %v310_v35 = vld [vmem:[#allocation9 + $0x148] sm:$0xff]  ;;  %v312_v36 = vld [vmem:[#allocation9 + $0x158] sm:$0xff] }
  0x31   :  { %v309_v37 = vld [vmem:[#allocation9 + $0x140] sm:$0xff]  ;;  %v311_v38 = vld [vmem:[#allocation9 + $0x150] sm:$0xff]  ;;  %v306_v39 = vld [vmem:[#allocation9 + $0x128] sm:$0xff] }
  0x32   :  { %v308_v40 = vld [vmem:[#allocation9 + $0x138] sm:$0xff]  ;;  %v305_v41 = vld [vmem:[#allocation9 + $0x120] sm:$0xff]  ;;  %v307_v42 = vld [vmem:[#allocation9 + $0x130] sm:$0xff] }
  0x33   :  { %343 = vmatpush1.xpose.msra.mxu0 %v325_v21  ;;  %413 = vmatpush1.xpose.msra.mxu1 %v327_v22  ;;  %v302_v43 = vld [vmem:[#allocation9 + $0x108] sm:$0xff]  ;;  %v304_v44 = vld [vmem:[#allocation9 + $0x118] sm:$0xff]  ;;  %v301_v45 = vld [vmem:[#allocation9 + $0x100] sm:$0xff] }
  0x34   :  { %344 = vmatprep.subr.mxu0 %v322_v23  ;;  %414 = vmatprep.subr.mxu1 %v324_v24  ;;  %v303_v46 = vld [vmem:[#allocation9 + $0x110] sm:$0xff]  ;;  %v298_v47 = vld [vmem:[#allocation9 + $0xe8] sm:$0xff]  ;;  %v300_v48 = vld [vmem:[#allocation9 + $0xf8] sm:$0xff] }
  0x35   :  { %v297_v49 = vld [vmem:[#allocation9 + $0xe0] sm:$0xff]  ;;  %v299_v50 = vld [vmem:[#allocation9 + $0xf0] sm:$0xff]  ;;  %v294_v51 = vld [vmem:[#allocation9 + $0xc8] sm:$0xff] }
  0x36   :  { %v296_v52 = vld [vmem:[#allocation9 + $0xd8] sm:$0xff]  ;;  %v293_v53 = vld [vmem:[#allocation9 + $0xc0] sm:$0xff]  ;;  %v295_v54 = vld [vmem:[#allocation9 + $0xd0] sm:$0xff] }
  0x37   :  { %345 = vmatpush1.xpose.msra.mxu0 %v321_v25  ;;  %415 = vmatpush1.xpose.msra.mxu1 %v323_v26  ;;  %v290_v55 = vld [vmem:[#allocation9 + $0xa8] sm:$0xff]  ;;  %v292_v56 = vld [vmem:[#allocation9 + $0xb8] sm:$0xff]  ;;  %v289_v57 = vld [vmem:[#allocation9 + $0xa0] sm:$0xff] }
  0x38   :  { %346 = vmatprep.subr.mxu0 %v318_v27  ;;  %416 = vmatprep.subr.mxu1 %v320_v28  ;;  %v291_v58 = vld [vmem:[#allocation9 + $0xb0] sm:$0xff]  ;;  %v286_v59 = vld [vmem:[#allocation9 + $0x88] sm:$0xff]  ;;  %v288_v60 = vld [vmem:[#allocation9 + $0x98] sm:$0xff] }
  0x39   :  { %v285_v61 = vld [vmem:[#allocation9 + $0x80] sm:$0xff]  ;;  %v287_v62 = vld [vmem:[#allocation9 + $0x90] sm:$0xff]  ;;  %v282_v63 = vld [vmem:[#allocation9 + $0x68] sm:$0xff] }
  0x3a   :  { %v284_v0 = vld [vmem:[#allocation9 + $0x78] sm:$0xff]  ;;  %v281_v1 = vld [vmem:[#allocation9 + $0x60] sm:$0xff]  ;;  %v283_v2 = vld [vmem:[#allocation9 + $0x70] sm:$0xff] }
  0x3b   :  { %347 = vmatpush1.xpose.msra.mxu0 %v317_v29  ;;  %417 = vmatpush1.xpose.msra.mxu1 %v319_v30  ;;  %v278_v3 = vld [vmem:[#allocation9 + $0x48] sm:$0xff]  ;;  %v280_v4 = vld [vmem:[#allocation9 + $0x58] sm:$0xff]  ;;  %v277_v5 = vld [vmem:[#allocation9 + $0x40] sm:$0xff] }
  0x3c   :  { %348 = vmatprep.subr.mxu0 %v314_v31  ;;  %418 = vmatprep.subr.mxu1 %v316_v32  ;;  %v279_v6 = vld [vmem:[#allocation9 + $0x50] sm:$0xff]  ;;  %v274_v7 = vld [vmem:[#allocation9 + $0x28] sm:$0xff]  ;;  %v276_v8 = vld [vmem:[#allocation9 + $0x38] sm:$0xff] }
  0x3d   :  { %v273_v9 = vld [vmem:[#allocation9 + $0x20] sm:$0xff]  ;;  %v275_v10 = vld [vmem:[#allocation9 + $0x30] sm:$0xff]  ;;  %v270_v11 = vld [vmem:[#allocation9 + $0x8] sm:$0xff] }
  0x3e   :  { %v272_v12 = vld [vmem:[#allocation9 + $0x18] sm:$0xff]  ;;  %v269_v18 = vld [vmem:[#allocation9] sm:$0xff]  ;;  %v271_v19 = vld [vmem:[#allocation9 + $0x10] sm:$0xff] }
  0x3f   :  { %349 = vmatpush1.xpose.msra.mxu0 %v313_v33  ;;  %419 = vmatpush1.xpose.msra.mxu1 %v315_v34  ;;  %v77_v13 = vld [vmem:[#allocation3] sm:$0xff] }
  0x40   :  { %350 = vmatprep.subr.mxu0 %v310_v35  ;;  %420 = vmatprep.subr.mxu1 %v312_v36  ;;  %v501_v30 = vld [vmem:[%s655_s3] ss:$0 sm:$0xff] }
  0x43   :  { %351 = vmatpush1.xpose.msra.mxu0 %v309_v37  ;;  %421 = vmatpush1.xpose.msra.mxu1 %v311_v38 }
  0x44   :  { %352 = vmatprep.subr.mxu0 %v306_v39  ;;  %422 = vmatprep.subr.mxu1 %v308_v40 }
  0x47   :  { %353 = vmatpush1.xpose.msra.mxu0 %v305_v41  ;;  %423 = vmatpush1.xpose.msra.mxu1 %v307_v42 }
  0x48   :  { %354 = vmatprep.subr.mxu0 %v302_v43  ;;  %424 = vmatprep.subr.mxu1 %v304_v44 }
  0x4b   :  { %355 = vmatpush1.xpose.msra.mxu0 %v301_v45  ;;  %425 = vmatpush1.xpose.msra.mxu1 %v303_v46 }
  0x4c   :  { %356 = vmatprep.subr.mxu0 %v298_v47  ;;  %426 = vmatprep.subr.mxu1 %v300_v48 }
  0x4f   :  { %357 = vmatpush1.xpose.msra.mxu0 %v297_v49  ;;  %427 = vmatpush1.xpose.msra.mxu1 %v299_v50 }
  0x50   :  { %358 = vmatprep.subr.mxu0 %v294_v51  ;;  %428 = vmatprep.subr.mxu1 %v296_v52 }
  0x53   :  { %359 = vmatpush1.xpose.msra.mxu0 %v293_v53  ;;  %429 = vmatpush1.xpose.msra.mxu1 %v295_v54 }
  0x54   :  { %360 = vmatprep.subr.mxu0 %v290_v55  ;;  %430 = vmatprep.subr.mxu1 %v292_v56 }
  0x57   :  { %361 = vmatpush1.xpose.msra.mxu0 %v289_v57  ;;  %431 = vmatpush1.xpose.msra.mxu1 %v291_v58 }
  0x58   :  { %362 = vmatprep.subr.mxu0 %v286_v59  ;;  %432 = vmatprep.subr.mxu1 %v288_v60 }
  0x5b   :  { %363 = vmatpush1.xpose.msra.mxu0 %v285_v61  ;;  %433 = vmatpush1.xpose.msra.mxu1 %v287_v62 }
  0x5c   :  { %364 = vmatprep.subr.mxu0 %v282_v63  ;;  %434 = vmatprep.subr.mxu1 %v284_v0 }
  0x5f   :  { %365 = vmatpush1.xpose.msra.mxu0 %v281_v1  ;;  %435 = vmatpush1.xpose.msra.mxu1 %v283_v2 }
  0x60   :  { %366 = vmatprep.subr.mxu0 %v278_v3  ;;  %436 = vmatprep.subr.mxu1 %v280_v4 }
  0x63   :  { %367 = vmatpush1.xpose.msra.mxu0 %v277_v5  ;;  %437 = vmatpush1.xpose.msra.mxu1 %v279_v6 }
  0x64   :  { %368 = vmatprep.subr.mxu0 %v274_v7  ;;  %438 = vmatprep.subr.mxu1 %v276_v8 }
  0x67   :  { %369 = vmatpush1.xpose.msra.mxu0 %v273_v9  ;;  %439 = vmatpush1.xpose.msra.mxu1 %v275_v10 }
  0x68   :  { %370 = vmatprep.subr.mxu0 %v270_v11  ;;  %440 = vmatprep.subr.mxu1 %v272_v12 }
  0x6b   :  { %371 = vmatpush1.xpose.msra.mxu0 %v269_v18  ;;  %441 = vmatpush1.xpose.msra.mxu1 %v271_v19 }
  0xb6   :  { %v81_v14 = vpop.xlane.xlu0 %80 }
  0xb7   :  { %v82_v15 = vadd.f32 %v81_v14, %v77_v13 }
  0xb9   :  { %84 = vst.msk [vmem:[#allocation3] sm:$0xff] %vm65_vm0, %v82_v15 }
  0xc0   :  { %v253_v16 = vld [vmem:[#allocation3] sm:$0xff] }
  0xc1   :  { %v254_v17 = vmax.f32 %v253_v16, 1.0 }
  0xc3   :  { %511 = vrcp.f32 %v254_v17 }
  0xd0   :  { %v512_v20 = vpop.eup %511 }
  0xd1   :  { %262 = vperm.xlu0 %510, %v512_v20  }
  0xec   :  { %v237_v21 = vpop.f32.mrf.mxu1  ;;  %v166_v22 = vpop.f32.mrf.mxu0 }
  0xee   :  { %v239_v23 = vpop.f32.mrf.mxu1  ;;  %v168_v24 = vpop.f32.mrf.mxu0 }
 0x14c   :  { %v263_v25 = vpop.permute.xlu0 %262 }
 0x14d   :  { %v265_v26 = vmul.f32 %v263_v25, %v166_v22  ;;  %v266_v27 = vmul.f32 %v263_v25, %v168_v24  ;;  %v267_v28 = vmul.f32 %v263_v25, %v237_v21  ;;  %v268_v29 = vmul.f32 %v263_v25, %v239_v23 }
 0x14f   :  { %404 = vmatprep.mubr.f32.mxu0 %v266_v27  ;;  %474 = vmatprep.mubr.f32.mxu1 %v268_v29 }
 0x150   :  { %405 = vmatmul.mubr.f32.vlgmr.msra.gmra.mxu0 %v265_v26  ;;  %475 = vmatmul.mubr.f32.vlgmr.msra.gmra.mxu1 %v267_v28 }
 0x210   :  { %v406_v31 = vpop.f32.mrf.mxu0  ;;  %v476_v32 = vpop.f32.mrf.mxu1 }
 0x211   :  { %v407_v33 = vadd.f32 %v501_v30, %v406_v31 }
 0x212   :  { %v408_v34 = vpop.f32.mrf.mxu0  ;;  %v478_v35 = vpop.f32.mrf.mxu1 }
 0x213   :  { %v477_v36 = vadd.f32 %v476_v32, %v407_v33 }
 0x215   :  { %480 = vst [vmem:[#allocation10] sm:$0xff] %v477_v36 }
 0x216   :  { %584 = shalt.err (!%p581_p5)
}
 0x217   :  { %490 = dma.vmem_to_hbm [thread:$0]  %s488_s7, 128, %s656_s4, [#allocation6]  }
 0x218   :  { %597 = dma.done.wait [#allocation6], 128  }
 0x219   :  { %598 = vsyncadd [#allocation6], 4294967168 }
 0x21a   :  { %494 = vsyncpa [#allocation5], 1 }
 0x21b   :  { %495 = vsyncpa [#allocation8], 1 }
 0x21c   :  { %496 = vsyncpa [#allocation6], 1 }

</bundles_post_ra>
